<compile_context>
chip_gen: v7x
topology: tpu7x:2x2x1
jax: 0.10.0
libtpu: 0.0.40
codegen_flags: <defaults>
</compile_context>

<pallas_src>
import functools
import math

import jax
import jax.numpy as jnp
from jax.experimental import pallas as pl
from jax.experimental.pallas import tpu as pltpu


# ----------------------------------------------------------------------------
# Kernel: fused spatial-sum -> k-tap channel conv -> sigmoid -> rescale
# ----------------------------------------------------------------------------
def _eca_kernel(w_ref, x_ref, o_ref, spad_ref, *, channels, pad):
    """One grid step = one batch tile.

    w_ref    : (k,) f32 in SMEM — conv1d taps pre-scaled by 1/(H*W)
    x_ref    : (NB, C, HW) input block (native dtype); C on sublanes, HW on lanes
    o_ref    : (NB, C, HW) output block
    spad_ref : (NB, C + 2*pad, 1) f32 VMEM scratch holding zero-padded channel sums
    """
    C = channels
    k = 2 * pad + 1

    # Spatial sum (cast-on-read, f32 accumulation); channels stay on sublanes.
    sums = jnp.sum(x_ref[...].astype(jnp.float32), axis=2, keepdims=True)  # (NB,C,1)

    # Zero-padded channel axis lives in a tiny scratch so each conv tap is a
    # plain sublane window read — no C x C matrix, no MXU, no lane shifts.
    spad_ref[...] = jnp.zeros_like(spad_ref)
    spad_ref[:, pad:pad + C, :] = sums

    gate = w_ref[0] * spad_ref[:, 0:C, :]
    for j in range(1, k):
        gate = gate + w_ref[j] * spad_ref[:, j:j + C, :]
    gate = jax.nn.sigmoid(gate)                                   # EUP, (NB, C, 1)

    # Channel-wise rescale in the native dtype (bf16 VALU on v6e/v7x);
    # gate broadcasts along the lane (HW) axis.
    o_ref[...] = (x_ref[...] * gate.astype(o_ref.dtype)).astype(o_ref.dtype)


# ----------------------------------------------------------------------------
# Wrapper
# ----------------------------------------------------------------------------
def _round_up(x, m):
    return -(-x // m) * m


def _vmem_capacity_bytes():
    try:
        return int(pltpu.get_tpu_info().vmem_capacity_bytes)
    except Exception:  # best-effort hardware query
        return 64 << 20  # conservative: v7x physical VMEM per TensorCore


def _pick_batch_block(n, img_bytes, target_block_bytes):
    """Largest divisor of n whose block fits the target, keeping >=2 grid steps."""
    nb = 1
    for cand in range(1, n + 1):
        if n % cand:
            continue
        if cand * img_bytes > target_block_bytes:
            break
        if n // cand >= 2 or n == 1:
            nb = cand
    return nb


def eca_block_forward(x_nchw, conv_w):
    """NCHW in, NCHW out — same convention as the PyTorch module.

    conv_w: the Conv1d(1, 1, k, bias=False) weight; any shape flattening to (k,), k odd.
    """
    N, C, H, W = x_nchw.shape
    HW = H * W
    x3 = x_nchw.reshape(N, C, HW)          # contiguous reshape: no copy / transpose

    w = conv_w.reshape(-1).astype(jnp.float32)
    k = int(w.shape[0])
    pad = (k - 1) // 2
    w_scaled = w * (1.0 / float(HW))       # fold the mean's 1/HW into the taps

    itemsize = jnp.dtype(x_nchw.dtype).itemsize
    img_bytes = C * HW * itemsize

    cap = _vmem_capacity_bytes()
    target_block = max(1 << 20, min(8 << 20, cap // 8))
    nb = _pick_batch_block(N, img_bytes, target_block)
    # TODO(synk): when a single image exceeds the VMEM budget (huge C*HW) or
    # N == 1, add an HW-tiled two-phase grid (accumulate per-channel sums, then
    # rescale) instead of relying on one oversized resident block / one grid step.

    block_bytes = nb * img_bytes
    scratch_bytes = nb * _round_up(C + 2 * pad, 8) * 128 * 4    # lane-padded f32 scratch
    need = 4 * block_bytes + scratch_bytes + (2 << 20)          # dbl-buffered in+out + slack
    vmem_limit = int(min(max(need, 32 << 20), int(cap * 0.9)))

    cost = pl.CostEstimate(
        flops=2 * N * C * HW + 2 * k * N * C,
        transcendentals=N * C,
        bytes_accessed=2 * N * C * HW * itemsize + k * 4,
    )

    kernel = functools.partial(_eca_kernel, channels=C, pad=pad)
    out = pl.pallas_call(
        kernel,
        out_shape=jax.ShapeDtypeStruct((N, C, HW), x_nchw.dtype),
        grid_spec=pltpu.PrefetchScalarGridSpec(
            num_scalar_prefetch=0,
            grid=(N // nb,),
            in_specs=[
                pl.BlockSpec(memory_space=pltpu.MemorySpace.SMEM),   # conv taps (k,)
                pl.BlockSpec((nb, C, HW), lambda n: (n, 0, 0)),      # activations
            ],
            out_specs=pl.BlockSpec((nb, C, HW), lambda n: (n, 0, 0)),
            scratch_shapes=[pltpu.VMEM((nb, C + 2 * pad, 1), jnp.float32)],
        ),
        compiler_params=pltpu.CompilerParams(
            dimension_semantics=("parallel",),
            vmem_limit_bytes=vmem_limit,
        ),
        cost_estimate=cost,
    )(w_scaled, x3)
    return out.reshape(N, C, H, W)


# ----------------------------------------------------------------------------
# Parameter prep (matches the PyTorch module's kernel-size rule and init)
# ----------------------------------------------------------------------------
def eca_kernel_size(channel, b=1, gamma=2):
    k = int(abs((math.log(channel, 2) + b) / gamma))
    return k if k % 2 else k + 1


def init_conv_weight(key, channel, b=1, gamma=2):
    """Deterministic Conv1d(1,1,k,bias=False) weight (PyTorch-style uniform bound)."""
    k = eca_kernel_size(channel, b=b, gamma=gamma)
    bound = 1.0 / math.sqrt(k)                 # fan_in = in_channels * k = k
    return jax.random.uniform(key, (k,), jnp.float32, -bound, bound)


# ----------------------------------------------------------------------------
# Pure-JAX reference (for correctness check)
# ----------------------------------------------------------------------------
def _ref_eca(x_nchw, conv_w):
    N, C, H, W = x_nchw.shape
    w = conv_w.reshape(-1).astype(jnp.float32)
    k = w.shape[0]
    pad = (k - 1) // 2
    y = jnp.mean(x_nchw.astype(jnp.float32), axis=(2, 3))          # (N, C)
    yp = jnp.pad(y, ((0, 0), (pad, pad)))
    gate = sum(w[j] * yp[:, j:j + C] for j in range(k))            # conv1d over channels
    gate = jax.nn.sigmoid(gate)
    return x_nchw.astype(jnp.float32) * gate[:, :, None, None]


# ----------------------------------------------------------------------------
if __name__ == "__main__":
    key = jax.random.PRNGKey(0)
    kx1, kw1, kx2, kw2 = jax.random.split(key, 4)

    # Case 1: f32, lane-aligned spatial size (HW = 256); C=16 -> kernel_size 3.
    N, C, H, W = 2, 16, 16, 16
    x = jax.random.normal(kx1, (N, C, H, W), jnp.float32)
    conv_w = init_conv_weight(kw1, C)
    out = eca_block_forward(x, conv_w)
    jax.block_until_ready(out)
    ref = _ref_eca(x, conv_w)
    assert out.shape == (N, C, H, W)
    assert jnp.allclose(out, ref, atol=1e-5, rtol=1e-5)

    # Case 2: bf16, spatial size not a multiple of 128 (masked-lane store path).
    N, C, H, W = 2, 32, 7, 7
    xb = jax.random.normal(kx2, (N, C, H, W), jnp.float32).astype(jnp.bfloat16)
    conv_wb = init_conv_weight(kw2, C)
    outb = eca_block_forward(xb, conv_wb)
    jax.block_until_ready(outb)
    refb = _ref_eca(xb, conv_wb)
    assert outb.dtype == jnp.bfloat16
    assert jnp.allclose(outb.astype(jnp.float32), refb, atol=5e-2, rtol=5e-2)

    print("KERNEL_OK")
</pallas_src>

<mosaic_0001>
module attributes {stable_mosaic.version = 11 : i64} {
  func.func @_eca_kernel(%arg0: i32, %arg1: memref<3xf32, #tpu.memory_space<smem>>, %arg2: memref<1x16x256xf32, #tpu.memory_space<vmem>>, %arg3: memref<1x16x256xf32, #tpu.memory_space<vmem>>, %arg4: memref<1x18x1xf32, #tpu.memory_space<vmem>>) attributes {dimension_semantics = [#tpu.dimension_semantics<parallel>], iteration_bounds = array<i64: 2>, scalar_prefetch = 0 : i64, scratch_operands = 1 : i64, tpu.core_type = #tpu.core_type<tc>, window_params = [{transform_indices = @transform_0, window_bounds = array<i64: 3>}, {transform_indices = @transform_1, window_bounds = array<i64: 1, 16, 256>}, {transform_indices = @transform_2, window_bounds = array<i64: 1, 16, 256>}]} {
    %c0 = arith.constant 0 : index
    %c0_0 = arith.constant 0 : index
    %c0_1 = arith.constant 0 : index
    %0 = vector.load %arg2[%c0, %c0_0, %c0_1] : memref<1x16x256xf32, #tpu.memory_space<vmem>>, vector<1x16x256xf32>
    %cst = arith.constant dense<0.000000e+00> : vector<1x16xf32>
    %1 = vector.multi_reduction <add>, %0, %cst [2] : vector<1x16x256xf32> to vector<1x16xf32>
    %2 = vector.shape_cast %1 : vector<1x16xf32> to vector<1x16x1xf32>
    %cst_2 = arith.constant 0.000000e+00 : f32
    %3 = vector.broadcast %cst_2 : f32 to vector<1x18x1xf32>
    %c0_3 = arith.constant 0 : index
    %c0_4 = arith.constant 0 : index
    %c0_5 = arith.constant 0 : index
    %4 = vector.load %arg4[%c0_3, %c0_4, %c0_5] : memref<1x18x1xf32, #tpu.memory_space<vmem>>, vector<1x18x1xf32>
    tpu.vector_store %arg4[%c0_3, %c0_4, %c0_5], %3 {strides = array<i32>} : memref<1x18x1xf32, #tpu.memory_space<vmem>>, vector<1x18x1xf32>,
    %c0_6 = arith.constant 0 : index
    %c1 = arith.constant 1 : index
    %c0_7 = arith.constant 0 : index
    %5 = vector.load %arg4[%c0_6, %c1, %c0_7] : memref<1x18x1xf32, #tpu.memory_space<vmem>>, vector<1x16x1xf32>
    tpu.vector_store %arg4[%c0_6, %c1, %c0_7], %2 {strides = array<i32>} : memref<1x18x1xf32, #tpu.memory_space<vmem>>, vector<1x16x1xf32>,
    %c0_8 = arith.constant 0 : index
    %6 = memref.load %arg1[%c0_8] : memref<3xf32, #tpu.memory_space<smem>>
    %c0_9 = arith.constant 0 : index
    %c0_10 = arith.constant 0 : index
    %c0_11 = arith.constant 0 : index
    %7 = vector.load %arg4[%c0_9, %c0_10, %c0_11] : memref<1x18x1xf32, #tpu.memory_space<vmem>>, vector<1x16x1xf32>
    %8 = vector.broadcast %6 : f32 to vector<1x16x1xf32>
    %9 = arith.mulf %8, %7 : vector<1x16x1xf32>
    %c1_12 = arith.constant 1 : index
    %10 = memref.load %arg1[%c1_12] : memref<3xf32, #tpu.memory_space<smem>>
    %c0_13 = arith.constant 0 : index
    %c1_14 = arith.constant 1 : index
    %c0_15 = arith.constant 0 : index
    %11 = vector.load %arg4[%c0_13, %c1_14, %c0_15] : memref<1x18x1xf32, #tpu.memory_space<vmem>>, vector<1x16x1xf32>
    %12 = vector.broadcast %10 : f32 to vector<1x16x1xf32>
    %13 = arith.mulf %12, %11 : vector<1x16x1xf32>
    %14 = arith.addf %9, %13 : vector<1x16x1xf32>
    %c2 = arith.constant 2 : index
    %15 = memref.load %arg1[%c2] : memref<3xf32, #tpu.memory_space<smem>>
    %c0_16 = arith.constant 0 : index
    %c2_17 = arith.constant 2 : index
    %c0_18 = arith.constant 0 : index
    %16 = vector.load %arg4[%c0_16, %c2_17, %c0_18] : memref<1x18x1xf32, #tpu.memory_space<vmem>>, vector<1x16x1xf32>
    %17 = vector.broadcast %15 : f32 to vector<1x16x1xf32>
    %18 = arith.mulf %17, %16 : vector<1x16x1xf32>
    %19 = arith.addf %14, %18 : vector<1x16x1xf32>
    %20 = arith.negf %19 : vector<1x16x1xf32>
    %21 = math.exp %20 : vector<1x16x1xf32>
    %cst_19 = arith.constant 1.000000e+00 : f32
    %22 = vector.broadcast %cst_19 : f32 to vector<1x16x1xf32>
    %23 = arith.addf %22, %21 : vector<1x16x1xf32>
    %24 = arith.divf %22, %23 : vector<1x16x1xf32>
    %c0_20 = arith.constant 0 : index
    %c0_21 = arith.constant 0 : index
    %c0_22 = arith.constant 0 : index
    %25 = vector.load %arg2[%c0_20, %c0_21, %c0_22] : memref<1x16x256xf32, #tpu.memory_space<vmem>>, vector<1x16x256xf32>
    %26 = vector.broadcast %24 : vector<1x16x1xf32> to vector<1x16x256xf32>
    %27 = arith.mulf %25, %26 : vector<1x16x256xf32>
    %c0_23 = arith.constant 0 : index
    %c0_24 = arith.constant 0 : index
    %c0_25 = arith.constant 0 : index
    %28 = vector.load %arg3[%c0_23, %c0_24, %c0_25] : memref<1x16x256xf32, #tpu.memory_space<vmem>>, vector<1x16x256xf32>
    tpu.vector_store %arg3[%c0_23, %c0_24, %c0_25], %27 {strides = array<i32>} : memref<1x16x256xf32, #tpu.memory_space<vmem>>, vector<1x16x256xf32>,
    return
  }
  func.func @transform_0(%arg0: i32) -> i32 {
    %c0_i32 = arith.constant 0 : i32
    %c0_i32_0 = arith.constant 0 : i32
    return %c0_i32 : i32
  }
  func.func @transform_1(%arg0: i32) -> (i32, i32, i32) {
    %c0_i32 = arith.constant 0 : i32
    %c0_i32_0 = arith.constant 0 : i32
    %c0_i32_1 = arith.constant 0 : i32
    return %arg0, %c0_i32, %c0_i32_0 : i32, i32, i32
  }
  func.func @transform_2(%arg0: i32) -> (i32, i32, i32) {
    %c0_i32 = arith.constant 0 : i32
    %c0_i32_0 = arith.constant 0 : i32
    %c0_i32_1 = arith.constant 0 : i32
    return %arg0, %c0_i32, %c0_i32_0 : i32, i32, i32
  }
}

</mosaic_0001>

<bundles_post_ra>
// kernel: tpu_custom_call.1
= control target key start
LH: loop header
LB: loop body
LE: loop exit
PB: predicated region body
PF: predicated region fallthrough
CT: control target
= control target key end

     0   :  { %7 = vsyncpa [#allocation6], 0  ;;  %s786_s0 = inlined_call_operand.hbm [shape: f32[3], index: 0, kind: input, shape index: {}]   ;;  %s787_s1 = inlined_call_operand.hbm [shape: f32[2,16,256], index: 1, kind: input, shape index: {}]   ;;  %s788_s2 = inlined_call_operand.hbm [shape: f32[2,16,256], index: 2, kind: output, shape index: {}]  }
   0x1   :  { %8 = vsyncpa [#allocation4], 0 }
   0x2   :  { %10 = vsyncpa [#allocation4 + $0x1], 0 }
   0x3   :  { %11 = vsyncpa [#allocation5], 0 }
   0x4   :  { %13 = vsyncpa [#allocation5 + $0x1], 0  ;;  %s580_s9 = smov 0   ;;  %s582_s10 = smov 0  }
   0x5   :  { %s584_s11 = smov 0   ;;  %s586_s12 = smov 0  }
   0x6 LB: > { %s601_s13 = sadd.s32 4294967295, %s554_s12   ;;  %s346_s14 = sadd.s32 4294967294, %s554_s12   ;;  %s554_s12 = sphi %s586_s12, %s808_s12   ;;  %s550_s11 = sphi %s584_s11, %s807_s11   ;;  %s546_s10 = sphi %s582_s10, %s806_s10   ;;  %s542_s9 = sphi %s580_s9, %s805_s9  }
   0x7   : > { %s605_s15 = sadd.s32 1, %s554_s12   ;;  %s47_s16 = sadd.s32 1, %s550_s11 }
   0x8   : > { %s44_s17 = ssub.s32 %s554_s12, %s605_s15  ;;  %p54_p0 = scmp.ne.s32.totalorder %s550_s11, %s546_s10 }
   0x9   : > { %p45_p1 = scmp.eq.s32.totalorder %s44_s17, 0  ;;  %p55_p2 = scmp.eq.s32.totalorder %s554_s12, 0 }
   0xa   : > { %p60_p3 = scmp.ne.s32.totalorder %s546_s10, %s542_s9  ;;  %p789_p4 = scmp.eq.s32.totalorder %s601_s13, 0 }
   0xb   : > { %s617_s18 = scalar_select %p45_p1, %s550_s11, %s47_s16  }
   0xc   : > { %p619_p5 = por %p55_p2, %p54_p0  ;;  %p625_p6 = por %p789_p4, %p60_p3 }
   0xd   : > { %p84_p7 = scmp.eq.s32.totalorder %s601_s13, 1  ;;  %p90_p8 = scmp.eq.s32.totalorder %s346_s14, 1 }
   0xe   : > { %s793_s20 = scalar_select %p625_p6, 1, 0 }
   0xf   : > { %p347_p9 = scmp.ge.s32.totalorder %s554_s12, 1  ;;  %p97_p10 = scmp.lt.s32.totalorder %s554_s12, 3 }
  0x10   : > { %p632_p11 = por %p84_p7, %p54_p0  ;;  %p636_p12 = por %p90_p8, %p60_p3 }
  0x11   : > { %p640_p13 = pnand %p347_p9, %p97_p10  ;;  %p389_p4 = scmp.lt.s32.totalorder %s554_s12, 2 }
  0x12   : > { %s794_s21 = scalar_select %p632_p11, 1, 0 }
  0x13   : > { %s795_s22 = scalar_select %p636_p12, 1, 0 }
  0x14   : > { %p376_p2 = pneg %p640_p13  ;;  %s119_s24 = sand.u32 1, %s550_s11  }
  0x15   : > { %s366_s25 = sshll.u32 %s554_s12, 9  ;;  %p797_p6 = scmp.eq.s32.totalorder %s601_s13, 0 }
  0x16   : > { %p654_p7 = pnand %p389_p4, %p619_p5  ;;  %s350_s27 = sshll.u32 %s119_s24, 5 }
  0x17   : > { %p377_p0 = pnand %p376_p2, %p797_p6  ;;  %s441_s30 = scalar_lea.hbm %s786_s0, 16 }
  0x18   : > { %p442_p3 = scmp.ne.s32.totalorder %s786_s0, %s441_s30  ;;  %p448_p6 = scmp.lt.u32.totalorder %s441_s30, %s786_s0 }
  0x19   : > { %p443_p8 = pneg %p377_p0 }
  0x1b   : > { %p444_p9 = pnand %p443_p8, %p442_p3 }
  0x1d   : > { %p445_p10 = pneg %p444_p9 }
  0x1f   : > { %p450_p4 = pnand %p448_p6, %p445_p10 }
  0x21   : > { %453 = shalt.err (!%p450_p4)
}
  0x22   : > { %s556_s7 = smov [#allocation3]   ;;  %s673_s19 = scalar_lea.hbm %s787_s1, %s366_s25 }
  0x23   : > { %379 = dma.hbm_to_smem (!%p377_p0), %s786_s0, 16, %s556_s7, [#allocation6]  }
  0x24   : > { %s123_s28 = scalar_lea.vmem [#allocation7], %s350_s27  ;;  %s677_s30 = scalar_lea.sflag [#allocation4], %s119_s24 }
  0x25   : > { %s130_s29 = sshll.u32 %s123_s28, 4  ;;  %s454_s3 = scalar_lea.hbm %s673_s19, 512  ;;  %s675_s29 = int_to_ptr.vmem [resolvable:$true] %s130_s29 }
  0x26   : > { %p455_p5 = scmp.ne.s32.totalorder %s673_s19, %s454_s3  ;;  %p456_p2 = pneg %p654_p7 }
  0x27   : > { %s459_s5 = scalar_lea.hbm %s787_s1, 1024  ;;  %p460_p8 = scmp.lt.u32.totalorder %s673_s19, %s787_s1 }
  0x28   : > { %p457_p0 = pnand %p456_p2, %p455_p5  ;;  %p461_p9 = scmp.lt.u32.totalorder %s459_s5, %s454_s3 }
  0x29   : > { %p463_p6 = scmp.lt.u32.totalorder %s454_s3, %s673_s19 }
  0x2a   : > { %p458_p3 = pneg %p457_p0  ;;  %p462_p10 = por %p461_p9, %p460_p8 }
  0x2c   : > { %p464_p4 = por %p463_p6, %p462_p10 }
  0x2e   : > { %p465_p1 = pnand %p464_p4, %p458_p3 }
  0x30   : > { %468 = shalt.err (!%p465_p1)
}
  0x31   : > { %s469_s24 = scalar_lea.vmem %s675_s29, 512  ;;  %s557_s27 = smov [#allocation7]  }
  0x32   : > { %p470_p5 = scmp.ne.s32.totalorder %s675_s29, %s469_s24  ;;  %s474_s8 = sshll.u32 %s557_s27, 4  ;;  %s475_s8 = int_to_ptr.vmem [resolvable:$false] %s474_s8 }
  0x33   : > { %s476_s14 = scalar_lea.vmem %s475_s8, 1024  ;;  %p477_p11 = scmp.lt.s32.totalorder %s675_s29, %s475_s8 }
  0x34   : > { %p472_p0 = pnand %p470_p5, %p456_p2  ;;  %p478_p8 = scmp.lt.s32.totalorder %s476_s14, %s469_s24 }
  0x36   : > { %p473_p12 = pneg %p472_p0  ;;  %p479_p9 = por %p478_p8, %p477_p11 }
  0x38   : > { %p480_p10 = pnand %p479_p9, %p473_p12 }
  0x3a   : > { %483 = shalt.err (!%p480_p10)
}
  0x3b   : > { %s558_s16 = smov 256   ;;  %s559_s17 = smov 16  }
  0x3c   : > { %383 = dma.hbm_to_vmem [thread:$0]  (!%p654_p7), %s673_s19, 512, %s675_s29, %s677_s30, %s558_s16, %s558_s16, %s559_s17  }
  0x3d   : > { %142 = sbr.rel (%p640_p13) target bundleno = 411 (0x19b), region = 28  ;;  %p799_p1 = scmp.eq.s32.totalorder (!%p640_p13), %s601_s13, 0 }
  0x44   : > { %529 = dma.done.wait (%p799_p1), [#allocation6], 16   ;;  %p800_p2 = pmov %p799_p1 }
  0x45   : > { %s712_s28 = sand.u32 1, %s546_s10   ;;  %p801_p11 = scmp.ne.s32.totalorder %s793_s20, 0 }
  0x46   : > { %531 = vsyncadd (%p800_p2), [#allocation6], 4294967280  ;;  %s355_s3 = sshll.u32 %s712_s28, 5  ;;  %s149_s25 = scalar_lea.sflag [#allocation4], %s712_s28 }
  0x47   : > { %s152_s26 = scalar_lea.vmem [#allocation7], %s355_s3 }
  0x48   : > { %533 = dma.done.wait (%p801_p11), %s149_s25, 512  }
  0x49   : > { %535 = vsyncadd (%p801_p11), %s149_s25, 4294966784 }
  0x4a   : > { %157 = sfence }
  0x4b   : > { %v174_v0 = vld [vmem:[%s152_s26] sm:$0xff]  ;;  %v175_v1 = vld [vmem:[%s152_s26 + $0x8] sm:$0xff]  ;;  %v722_v2 = vld [vmem:[%s152_s26 + $0x10] sm:$0xff]  ;;  %vm184_vm0 = vcmask 7168   ;;  %v560_v5 = vmov 0.0   ;;  %vm187_vm1 = vcmask 1024  }
  0x4c   : > { %v178_v3 = vadd.f32 %v175_v1, %v174_v0  ;;  %v724_v4 = vld [vmem:[%s152_s26 + $0x18] sm:$0xff]  ;;  %185 = vst.msk [vmem:[#allocation2] sm:$0xff] %vm184_vm0, %v560_v5  ;;  %186 = vst.msk [vmem:[#allocation2 + $0x8] sm:$0xff] %vm184_vm0, %v560_v5  ;;  %v561_v7 = vmov 0   ;;  %s191_s20 = sld [smem:[#allocation3]]  ;;  %s357_s23 = sld [smem:[#allocation3 + $0x1]] }
  0x4d   : > { %v181_v6 = vadd.f32 %v724_v4, %v722_v2  ;;  %188 = vst.msk [vmem:[#allocation2 + $0x10] sm:$0x3] %vm187_vm1, %v560_v5  ;;  %431 = vset.pattern.permute.xlu1 %v561_v7  ;;  %432 = vset.pattern.permute.xlu0 %v561_v7  ;;  %s358_s19 = sld [smem:[#allocation3 + $0x2]]  ;;  %s173_s29 = scalar_lea.vmem [#allocation8], %s355_s3 }
  0x4e   : > { %179 = vadd.xlane.f32.xlu0 %v178_v3  ;;  %s261_s30 = sshll.u32 %s173_s29, 4  ;;  %s367_s4 = sshll.u32 %s601_s13, 9  ;;  %s735_s30 = int_to_ptr.vmem [resolvable:$true] %s261_s30 }
  0x4f   : > { %s740_s7 = scalar_lea.hbm %s788_s2, %s367_s4  ;;  %s248_s13 = scalar_lea.sflag [#allocation5], %s712_s28 }
  0x50   : > { %s484_s24 = scalar_lea.vmem %s735_s30, 512  ;;  %p802_p13 = scmp.ne.s32.totalorder %s794_s21, 0 }
  0x51   : > { %p485_p12 = scmp.ne.s32.totalorder %s735_s30, %s484_s24  ;;  %s562_s27 = smov [#allocation8]  }
  0x52   : > { %182 = vadd.xlane.f32.xlu0 %v181_v6  ;;  %v194_v10 = vstv %s191_s20  ;;  %v200_v11 = vstv %s357_s23  ;;  %s488_s8 = sshll.u32 %s562_s27, 4  ;;  %s489_s8 = int_to_ptr.vmem [resolvable:$false] %s488_s8 }
  0x53   : > { %v208_v16 = vstv %s358_s19  ;;  %p486_p7 = pnand %p485_p12, %p802_p13  ;;  %s490_s14 = scalar_lea.vmem %s489_s8, 1024 }
  0x54   : > { %p491_p6 = scmp.lt.s32.totalorder %s735_s30, %s489_s8  ;;  %p492_p4 = scmp.lt.s32.totalorder %s490_s14, %s484_s24 }
  0x55   : > { %p487_p3 = pneg %p486_p7 }
  0x56   : > { %p493_p5 = por %p492_p4, %p491_p6 }
  0x58   : > { %p494_p0 = pnand %p493_p5, %p487_p3 }
  0xdb   : > { %v180_v8 = vpop.xlane.xlu0 %179 }
  0xdc   : > { %189 = vst.msk [vmem:[#allocation2 + $0x1] sm:$0xff] %vm184_vm0, %v180_v8 }
  0xdf   : > { %v183_v9 = vpop.xlane.xlu0 %182 }
  0xe0   : > { %190 = vst.msk [vmem:[#allocation2 + $0x9] sm:$0xff] %vm184_vm0, %v183_v9 }
  0xe3   : > { %v192_v12 = vld [vmem:[#allocation2] sm:$0xff] }
  0xe4   : > { %v198_v13 = vld [vmem:[#allocation2 + $0x1] sm:$0xff]  ;;  %v195_v14 = vmul.f32 %v194_v10, %v192_v12 }
  0xe5   : > { %v201_v15 = vmul.f32 %v200_v11, %v198_v13 }
  0xe7   : > { %v206_v17 = vld [vmem:[#allocation2 + $0x2] sm:$0xff]  ;;  %v203_v19 = vadd.f32 %v201_v15, %v195_v14  ;;  %v207_v20 = vld [vmem:[#allocation2 + $0xa] sm:$0xff] }
  0xe8   : > { %v193_v18 = vld [vmem:[#allocation2 + $0x8] sm:$0xff]  ;;  %v209_v21 = vmul.f32 %v208_v16, %v206_v17  ;;  %v210_v26 = vmul.f32 %v208_v16, %v207_v20 }
  0xe9   : > { %v196_v22 = vmul.f32 %v194_v10, %v193_v18  ;;  %v199_v23 = vld [vmem:[#allocation2 + $0x9] sm:$0xff] }
  0xea   : > { %v202_v24 = vmul.f32 %v200_v11, %v199_v23  ;;  %v211_v25 = vadd.f32 %v209_v21, %v203_v19 }
  0xec   : > { %v204_v27 = vadd.f32 %v202_v24, %v196_v22  ;;  %v359_v28 = vmul.f32 -1.442695, %v211_v25 }
  0xee   : > { %v212_v29 = vadd.f32 %v210_v26, %v204_v27  ;;  %433 = vpow2.f32 %v359_v28 }
  0xf0   : > { %v360_v30 = vmul.f32 -1.442695, %v212_v29 }
  0xf2   : > { %435 = vpow2.f32 %v360_v30 }
  0xf8   : > { %v434_v31 = vpop.eup %433 }
  0xf9   : > { %v219_v32 = vadd.f32 1.0, %v434_v31 }
  0xfb   : > { %437 = vrcp.f32 %v219_v32 }
  0xfc   : > { %v436_v33 = vpop.eup %435 }
  0xfd   : > { %v220_v34 = vadd.f32 1.0, %v436_v33 }
  0xff   : > { %439 = vrcp.f32 %v220_v34 }
 0x105   : > { %v438_v35 = vpop.eup %437 }
 0x106   : > { %231 = vperm.xlu1 %431, %v438_v35  }
 0x109   : > { %v440_v36 = vpop.eup %439 }
 0x10a   : > { %236 = vperm.xlu1 %431, %v440_v36  }
 0x185   : > { %v232_v37 = vpop.permute.xlu1 %231 }
 0x186   : > { %v239_v38 = vmul.f32 %v232_v37, %v174_v0  ;;  %v240_v39 = vmul.f32 %v232_v37, %v175_v1 }
 0x188   : > { %243 = vst [vmem:[%s173_s29] sm:$0xff] %v239_v38  ;;  %244 = vst [vmem:[%s173_s29 + $0x8] sm:$0xff] %v240_v39 }
 0x189   : > { %v237_v40 = vpop.permute.xlu1 %236 }
 0x18a   : > { %v241_v41 = vmul.f32 %v237_v40, %v722_v2  ;;  %v242_v42 = vmul.f32 %v237_v40, %v724_v4 }
 0x18c   : > { %245 = vst [vmem:[%s173_s29 + $0x10] sm:$0xff] %v241_v41  ;;  %246 = vst [vmem:[%s173_s29 + $0x18] sm:$0xff] %v242_v42 }
 0x18d   : > { %497 = shalt.err (!%p494_p0)
}
 0x18e   : > { %s498_s16 = scalar_lea.hbm %s740_s7, 512  ;;  %s502_s25 = scalar_lea.hbm %s788_s2, 1024 }
 0x18f   : > { %p499_p8 = scmp.ne.s32.totalorder %s740_s7, %s498_s16  ;;  %p503_p1 = scmp.lt.u32.totalorder %s740_s7, %s788_s2 }
 0x190   : > { %p504_p2 = scmp.lt.u32.totalorder %s502_s25, %s498_s16  ;;  %p506_p12 = scmp.lt.u32.totalorder %s498_s16, %s740_s7 }
 0x191   : > { %p500_p9 = pnand %p499_p8, %p802_p13 }
 0x192   : > { %p505_p11 = por %p504_p2, %p503_p1 }
 0x193   : > { %p501_p10 = pneg %p500_p9 }
 0x194   : > { %p507_p7 = por %p506_p12, %p505_p11 }
 0x196   : > { %p508_p3 = pnand %p507_p7, %p501_p10 }
 0x198   : > { %511 = shalt.err (!%p508_p3)
}
 0x199   : > { %s563_s23 = smov 256   ;;  %s564_s19 = smov 16  }
 0x19a   : > { %374 = dma.vmem_to_hbm [thread:$0]  (%p802_p13), %s735_s30, 512, %s740_s7, %s248_s13, %s563_s23, %s563_s23, %s564_s19  }
 0x19b PF: > { %s276_s29 = sand.u32 1, %s542_s9   ;;  %p803_p6 = scmp.ne.s32.totalorder %s795_s22, 0 }
 0x19c   : > { %p804_p4 = scmp.ge.s32.totalorder %s554_s12, 2  ;;  %s277_s4 = scalar_lea.sflag [#allocation5], %s276_s29 }
 0x19e   : > { %p385_p5 = pnand %p804_p4, %p803_p6 }
 0x1a0   : > { %537 = dma.done.wait (!%p385_p5), %s277_s4, 512  }
 0x1a1   : > { %539 = vsyncadd (!%p385_p5), %s277_s4, 4294966784  ;;  %p16_p0 = scmp.ge.s32.totalorder %s605_s15, 4   ;;  %s805_s9 = smov %s546_s10 }
 0x1a2   : > { %s806_s10 = smov %s550_s11  ;;  %s807_s11 = smov %s617_s18 }
 0x1a3   : > { %s808_s12 = smov %s605_s15  ;;  %18 = sbr.rel (!%p16_p0) target bundleno = 6 (0x6), region = 78 }
 0x1aa   :  { %282 = vsyncpa [#allocation4], 1 }
 0x1ab   :  { %284 = vsyncpa [#allocation4 + $0x1], 1 }
 0x1ac   :  { %285 = vsyncpa [#allocation5], 1 }
 0x1ad   :  { %287 = vsyncpa [#allocation5 + $0x1], 1 }
 0x1ae   :  { %288 = vsyncpa [#allocation6], 1 }
 0x1af   :  { %290 = vsyncpa [#allocation6 + $0x1], 1 }

</bundles_post_ra>
